<compile_context>
chip_gen: v7x
topology: tpu7x:2x2x1
jax: 0.10.0
libtpu: 0.0.40
codegen_flags: <defaults>
</compile_context>

<pallas_src>
import jax
import jax.numpy as jnp
from jax import lax
from jax.experimental import pallas as pl
from jax.experimental.pallas import tpu as pltpu

_EPS = 1e-5


def _fold_bn(gamma, beta, mean, var):
    scale = gamma / jnp.sqrt(var + _EPS)
    shift = beta - mean * scale
    return scale.astype(jnp.float32), shift.astype(jnp.float32)


def _round_up(x, m):
    return (x + m - 1) // m * m


def attention_block(x1, x2, p):
    """x1: (N, C1, H, W), x2: (N, C2, H, W) in NCHW (PyTorch convention)."""
    N, C1, H, W = x1.shape
    C2 = x2.shape[1]
    O = p["w1"].shape[0]
    HW = H * W

    # Sublane-aligned channel layout for the padded activation block.
    off2 = _round_up(C1, 8)                 # x2 channels start here
    CP = _round_up(off2 + C2, 8)            # padded channels per tap (16)
    PR = max(CP, _round_up(O, 8))           # rows of packed-parameter tile
    K = 9 * CP                              # fused contraction dim

    # Batch blocking: at most 2 grid steps (v7x: one per TensorCore).
    if N % 2 == 0:
        n_blocks, TB = 2, N // 2
    else:
        n_blocks, TB = N, 1
    LW = TB * HW                            # lanes per grid step

    # ---- folded BN params (inference mode) ---------------------------------
    s1, t1 = _fold_bn(p["bn1_g"], p["bn1_b"], p["bn1_m"], p["bn1_v"])
    s2, t2 = _fold_bn(p["bn2_g"], p["bn2_b"], p["bn2_m"], p["bn2_v"])
    s3, t3 = _fold_bn(p["bn3_g"], p["bn3_b"], p["bn3_m"], p["bn3_v"])

    # ---- fused conv weights, BN3 folded in ---------------------------------
    # conv1(a1) + conv2(a2) == conv_cat over the padded 16-channel block.
    w1t = jnp.transpose(p["w1"].astype(jnp.float32), (2, 3, 0, 1)).reshape(9, O, C1)
    w2t = jnp.transpose(p["w2"].astype(jnp.float32), (2, 3, 0, 1)).reshape(9, O, C2)
    wt = jnp.zeros((9, O, CP), jnp.float32)
    wt = wt.at[:, :, 0:C1].set(w1t)
    wt = wt.at[:, :, off2:off2 + C2].set(w2t)
    wbig = jnp.transpose(wt, (1, 0, 2)).reshape(O, K) * s3[:, None]     # (O, K)
    bias = s3 * (p["b1"] + p["b2"]).astype(jnp.float32) + t3            # (O,)
    w3v = p["w3"].astype(jnp.float32).reshape(O)
    b3v = p["b3"].astype(jnp.float32).reshape(())

    # ---- packed small parameters: one (PR, 8) f32 tile ---------------------
    # col 0: BN scale, col 1: BN shift (padded-channel layout),
    # col 2: folded conv bias, col 3: 1x1 weights, col 4[0]: 1x1 bias.
    prm = jnp.zeros((PR, 8), jnp.float32)
    prm = prm.at[0:C1, 0].set(s1)
    prm = prm.at[off2:off2 + C2, 0].set(s2)
    prm = prm.at[0:C1, 1].set(t1)
    prm = prm.at[off2:off2 + C2, 1].set(t2)
    prm = prm.at[0:O, 2].set(bias)
    prm = prm.at[0:O, 3].set(w3v)
    prm = prm.at[0, 4].set(b3v)

    # ---- precomputed boundary masks (grid invariant): (9, TB*HW) -----------
    q = jnp.arange(HW)
    py = q // W
    px = q % W
    mrows = []
    for dy in range(3):
        for dx in range(3):
            rm = (py + (dy - 1) >= 0) & (py + (dy - 1) < H)
            cm = (px + (dx - 1) >= 0) & (px + (dx - 1) < W)
            mrows.append((rm & cm).astype(jnp.float32))
    masks = jnp.tile(jnp.stack(mrows), (1, TB))                         # (9, LW)

    # ---- lane-dense data layout (contiguous reshapes only) -----------------
    x1r = x1.astype(jnp.float32).reshape(N, C1, HW)
    x2r = x2.astype(jnp.float32).reshape(N, C2, HW)

    def kernel(x1_ref, x2_ref, m_ref, w_ref, p_ref, o_ref, apad_ref, col_ref):
        # Padded activation scratch: zero pad rows, write raw x1/x2 at
        # 8-aligned sublane offsets (no in-kernel channel concat).
        apad_ref[...] = jnp.zeros_like(apad_ref)
        for tb in range(TB):
            apad_ref[0:C1, tb * HW:(tb + 1) * HW] = x1_ref[tb]
            apad_ref[off2:off2 + C2, tb * HW:(tb + 1) * HW] = x2_ref[tb]

        # Folded BN + ReLU over the whole padded block (pad rows stay 0).
        s_pad = p_ref[0:CP, 0:1]
        t_pad = p_ref[0:CP, 1:2]
        a = jnp.maximum(apad_ref[...] * s_pad + t_pad, 0.0)             # (CP, LW)

        # im2col: 9 taps = lane-roll + host-precomputed boundary mask,
        # each stored as an aligned 16-row block of the (K, LW) scratch.
        for dy in range(3):
            for dx in range(3):
                t = dy * 3 + dx
                s = (dy - 1) * W + (dx - 1)
                if s == 0:
                    tap = a
                else:
                    tap = pltpu.roll(a, (-s) % LW, 1) * m_ref[t:t + 1, :]
                col_ref[t * CP:(t + 1) * CP, :] = tap

        # Single fused MXU matmul (conv1 + conv2, BN3 scale folded into w).
        z = jnp.dot(w_ref[...], col_ref[...],
                    preferred_element_type=jnp.float32)                 # (O, LW)
        h = jnp.maximum(z + p_ref[0:O, 2:3], 0.0)                       # bias + ReLU
        attn = (jnp.sum(h * p_ref[0:O, 3:4], axis=0, keepdims=True)
                + p_ref[0:1, 4:5])                                      # (1, LW)

        # attn * raw x2, lane-dense store (HW multiple of 128).
        for tb in range(TB):
            o_ref[tb] = (attn[:, tb * HW:(tb + 1) * HW]
                         * x2_ref[tb]).astype(o_ref.dtype)

    def const(shape):
        zeros = (0,) * len(shape)
        return pl.BlockSpec(shape, lambda n: zeros)

    out = pl.pallas_call(
        kernel,
        out_shape=jax.ShapeDtypeStruct((N, C2, HW), jnp.float32),
        grid_spec=pltpu.PrefetchScalarGridSpec(
            num_scalar_prefetch=0,
            grid=(n_blocks,),
            in_specs=[
                pl.BlockSpec((TB, C1, HW), lambda n: (n, 0, 0)),
                pl.BlockSpec((TB, C2, HW), lambda n: (n, 0, 0)),
                const((9, LW)),          # boundary masks
                const((O, K)),           # fused conv weights (BN3 folded)
                const((PR, 8)),          # packed small params
            ],
            out_specs=pl.BlockSpec((TB, C2, HW), lambda n: (n, 0, 0)),
            scratch_shapes=[
                pltpu.VMEM((CP, LW), jnp.float32),   # padded activation
                pltpu.VMEM((K, LW), jnp.float32),    # im2col stack
            ],
        ),
        # Batch blocks are independent -> shardable across v7x's 2 TCs.
        compiler_params=pltpu.CompilerParams(
            dimension_semantics=("parallel",)),
    )(x1r, x2r, masks, wbig, prm)

    return out.reshape(N, C2, H, W)                # free contiguous reshape


def _reference(x1, x2, p):
    """Pure-JAX reference (NCHW) for correctness checking."""
    def bn(x, g, b, m, v):
        return ((x - m[None, :, None, None])
                / jnp.sqrt(v[None, :, None, None] + _EPS)
                * g[None, :, None, None] + b[None, :, None, None])

    def conv(x, w, b, pad):
        y = lax.conv_general_dilated(
            x, w, (1, 1), [(pad, pad), (pad, pad)],
            dimension_numbers=("NCHW", "OIHW", "NCHW"))
        return y + b[None, :, None, None]

    e = conv(jax.nn.relu(bn(x1, p["bn1_g"], p["bn1_b"], p["bn1_m"], p["bn1_v"])),
             p["w1"], p["b1"], 1)
    d = conv(jax.nn.relu(bn(x2, p["bn2_g"], p["bn2_b"], p["bn2_m"], p["bn2_v"])),
             p["w2"], p["b2"], 1)
    o = e + d
    a = conv(jax.nn.relu(bn(o, p["bn3_g"], p["bn3_b"], p["bn3_m"], p["bn3_v"])),
             p["w3"], p["b3"], 0)
    return a * x2


if __name__ == "__main__":
    C1, C2, O = 4, 6, 8          # input_encoder, input_decoder, output_dim
    N, H, W = 2, 16, 16

    key = jax.random.PRNGKey(0)
    keys = jax.random.split(key, 20)

    def nrm(k, shape, s=0.1):
        return (jax.random.normal(k, shape) * s).astype(jnp.float32)

    params = dict(
        bn1_g=1.0 + nrm(keys[0], (C1,)), bn1_b=nrm(keys[1], (C1,)),
        bn1_m=nrm(keys[2], (C1,)), bn1_v=1.0 + jnp.abs(nrm(keys[3], (C1,))),
        bn2_g=1.0 + nrm(keys[4], (C2,)), bn2_b=nrm(keys[5], (C2,)),
        bn2_m=nrm(keys[6], (C2,)), bn2_v=1.0 + jnp.abs(nrm(keys[7], (C2,))),
        bn3_g=1.0 + nrm(keys[8], (O,)), bn3_b=nrm(keys[9], (O,)),
        bn3_m=nrm(keys[10], (O,)), bn3_v=1.0 + jnp.abs(nrm(keys[11], (O,))),
        w1=nrm(keys[12], (O, C1, 3, 3), 0.2), b1=nrm(keys[13], (O,)),
        w2=nrm(keys[14], (O, C2, 3, 3), 0.2), b2=nrm(keys[15], (O,)),
        w3=nrm(keys[16], (1, O, 1, 1), 0.2), b3=nrm(keys[17], (1,)),
    )

    x1 = jax.random.normal(keys[18], (N, C1, H, W), jnp.float32)
    x2 = jax.random.normal(keys[19], (N, C2, H, W), jnp.float32)

    out = jax.block_until_ready(attention_block(x1, x2, params))
    ref = jax.block_until_ready(_reference(x1, x2, params))

    assert out.shape == (N, C2, H, W), out.shape
    max_err = float(jnp.max(jnp.abs(out - ref)))
    assert jnp.allclose(out, ref, atol=1e-4, rtol=1e-4), max_err
    print("KERNEL_OK")
</pallas_src>

<mosaic_0001>
module attributes {stable_mosaic.version = 11 : i64} {
  func.func @kernel(%arg0: i32, %arg1: memref<1x4x256xf32, #tpu.memory_space<vmem>>, %arg2: memref<1x6x256xf32, #tpu.memory_space<vmem>>, %arg3: memref<9x256xf32, #tpu.memory_space<vmem>>, %arg4: memref<8x144xf32, #tpu.memory_space<vmem>>, %arg5: memref<16x8xf32, #tpu.memory_space<vmem>>, %arg6: memref<1x6x256xf32, #tpu.memory_space<vmem>>, %arg7: memref<16x256xf32, #tpu.memory_space<vmem>>, %arg8: memref<144x256xf32, #tpu.memory_space<vmem>>) attributes {dimension_semantics = [#tpu.dimension_semantics<parallel>], iteration_bounds = array<i64: 2>, scalar_prefetch = 0 : i64, scratch_operands = 2 : i64, tpu.core_type = #tpu.core_type<tc>, window_params = [{transform_indices = @transform_0, window_bounds = array<i64: 1, 4, 256>}, {transform_indices = @transform_1, window_bounds = array<i64: 1, 6, 256>}, {pipeline_mode = #tpu.pipeline_mode<synchronous>, transform_indices = @transform_2, window_bounds = array<i64: 9, 256>}, {pipeline_mode = #tpu.pipeline_mode<synchronous>, transform_indices = @transform_3, window_bounds = array<i64: 8, 144>}, {pipeline_mode = #tpu.pipeline_mode<synchronous>, transform_indices = @transform_4, window_bounds = array<i64: 16, 8>}, {transform_indices = @transform_5, window_bounds = array<i64: 1, 6, 256>}]} {
    %cst = arith.constant 0.000000e+00 : f32
    %0 = vector.broadcast %cst : f32 to vector<16x256xf32>
    %c0 = arith.constant 0 : index
    %c0_0 = arith.constant 0 : index
    %1 = vector.load %arg7[%c0, %c0_0] : memref<16x256xf32, #tpu.memory_space<vmem>>, vector<16x256xf32>
    tpu.vector_store %arg7[%c0, %c0_0], %0 {strides = array<i32>} : memref<16x256xf32, #tpu.memory_space<vmem>>, vector<16x256xf32>,
    %c0_1 = arith.constant 0 : index
    %c0_2 = arith.constant 0 : index
    %c0_3 = arith.constant 0 : index
    %2 = vector.load %arg1[%c0_1, %c0_2, %c0_3] : memref<1x4x256xf32, #tpu.memory_space<vmem>>, vector<1x4x256xf32>
    %3 = vector.shape_cast %2 : vector<1x4x256xf32> to vector<4x256xf32>
    %c0_4 = arith.constant 0 : index
    %c0_5 = arith.constant 0 : index
    %4 = vector.load %arg7[%c0_4, %c0_5] : memref<16x256xf32, #tpu.memory_space<vmem>>, vector<4x256xf32>
    tpu.vector_store %arg7[%c0_4, %c0_5], %3 {strides = array<i32>} : memref<16x256xf32, #tpu.memory_space<vmem>>, vector<4x256xf32>,
    %c0_6 = arith.constant 0 : index
    %c0_7 = arith.constant 0 : index
    %c0_8 = arith.constant 0 : index
    %5 = vector.load %arg2[%c0_6, %c0_7, %c0_8] : memref<1x6x256xf32, #tpu.memory_space<vmem>>, vector<1x6x256xf32>
    %6 = vector.shape_cast %5 : vector<1x6x256xf32> to vector<6x256xf32>
    %c8 = arith.constant 8 : index
    %c0_9 = arith.constant 0 : index
    %7 = vector.load %arg7[%c8, %c0_9] : memref<16x256xf32, #tpu.memory_space<vmem>>, vector<6x256xf32>
    tpu.vector_store %arg7[%c8, %c0_9], %6 {strides = array<i32>} : memref<16x256xf32, #tpu.memory_space<vmem>>, vector<6x256xf32>,
    %c0_10 = arith.constant 0 : index
    %c0_11 = arith.constant 0 : index
    %8 = vector.load %arg5[%c0_10, %c0_11] : memref<16x8xf32, #tpu.memory_space<vmem>>, vector<16x1xf32>
    %c0_12 = arith.constant 0 : index
    %c1 = arith.constant 1 : index
    %9 = vector.load %arg5[%c0_12, %c1] : memref<16x8xf32, #tpu.memory_space<vmem>>, vector<16x1xf32>
    %c0_13 = arith.constant 0 : index
    %c0_14 = arith.constant 0 : index
    %10 = vector.load %arg7[%c0_13, %c0_14] : memref<16x256xf32, #tpu.memory_space<vmem>>, vector<16x256xf32>
    %11 = vector.broadcast %8 : vector<16x1xf32> to vector<16x256xf32>
    %12 = arith.mulf %10, %11 : vector<16x256xf32>
    %13 = vector.broadcast %9 : vector<16x1xf32> to vector<16x256xf32>
    %14 = arith.addf %12, %13 : vector<16x256xf32>
    %cst_15 = arith.constant 0.000000e+00 : f32
    %15 = vector.broadcast %cst_15 : f32 to vector<16x256xf32>
    %16 = arith.maximumf %14, %15 : vector<16x256xf32>
    %c17_i32 = arith.constant 17 : i32
    %17 = tpu.dynamic_rotate %16 by %c17_i32 dim 1 : vector<16x256xf32>, i32 -> vector<16x256xf32>
    %c0_16 = arith.constant 0 : index
    %c0_17 = arith.constant 0 : index
    %18 = vector.load %arg3[%c0_16, %c0_17] : memref<9x256xf32, #tpu.memory_space<vmem>>, vector<1x256xf32>
    %19 = vector.broadcast %18 : vector<1x256xf32> to vector<16x256xf32>
    %20 = arith.mulf %17, %19 : vector<16x256xf32>
    %c0_18 = arith.constant 0 : index
    %c0_19 = arith.constant 0 : index
    %21 = vector.load %arg8[%c0_18, %c0_19] : memref<144x256xf32, #tpu.memory_space<vmem>>, vector<16x256xf32>
    tpu.vector_store %arg8[%c0_18, %c0_19], %20 {strides = array<i32>} : memref<144x256xf32, #tpu.memory_space<vmem>>, vector<16x256xf32>,
    %c16_i32 = arith.constant 16 : i32
    %22 = tpu.dynamic_rotate %16 by %c16_i32 dim 1 : vector<16x256xf32>, i32 -> vector<16x256xf32>
    %c1_20 = arith.constant 1 : index
    %c0_21 = arith.constant 0 : index
    %23 = vector.load %arg3[%c1_20, %c0_21] : memref<9x256xf32, #tpu.memory_space<vmem>>, vector<1x256xf32>
    %24 = vector.broadcast %23 : vector<1x256xf32> to vector<16x256xf32>
    %25 = arith.mulf %22, %24 : vector<16x256xf32>
    %c16 = arith.constant 16 : index
    %c0_22 = arith.constant 0 : index
    %26 = vector.load %arg8[%c16, %c0_22] : memref<144x256xf32, #tpu.memory_space<vmem>>, vector<16x256xf32>
    tpu.vector_store %arg8[%c16, %c0_22], %25 {strides = array<i32>} : memref<144x256xf32, #tpu.memory_space<vmem>>, vector<16x256xf32>,
    %c15_i32 = arith.constant 15 : i32
    %27 = tpu.dynamic_rotate %16 by %c15_i32 dim 1 : vector<16x256xf32>, i32 -> vector<16x256xf32>
    %c2 = arith.constant 2 : index
    %c0_23 = arith.constant 0 : index
    %28 = vector.load %arg3[%c2, %c0_23] : memref<9x256xf32, #tpu.memory_space<vmem>>, vector<1x256xf32>
    %29 = vector.broadcast %28 : vector<1x256xf32> to vector<16x256xf32>
    %30 = arith.mulf %27, %29 : vector<16x256xf32>
    %c32 = arith.constant 32 : index
    %c0_24 = arith.constant 0 : index
    %31 = vector.load %arg8[%c32, %c0_24] : memref<144x256xf32, #tpu.memory_space<vmem>>, vector<16x256xf32>
    tpu.vector_store %arg8[%c32, %c0_24], %30 {strides = array<i32>} : memref<144x256xf32, #tpu.memory_space<vmem>>, vector<16x256xf32>,
    %c1_i32 = arith.constant 1 : i32
    %32 = tpu.dynamic_rotate %16 by %c1_i32 dim 1 : vector<16x256xf32>, i32 -> vector<16x256xf32>
    %c3 = arith.constant 3 : index
    %c0_25 = arith.constant 0 : index
    %33 = vector.load %arg3[%c3, %c0_25] : memref<9x256xf32, #tpu.memory_space<vmem>>, vector<1x256xf32>
    %34 = vector.broadcast %33 : vector<1x256xf32> to vector<16x256xf32>
    %35 = arith.mulf %32, %34 : vector<16x256xf32>
    %c48 = arith.constant 48 : index
    %c0_26 = arith.constant 0 : index
    %36 = vector.load %arg8[%c48, %c0_26] : memref<144x256xf32, #tpu.memory_space<vmem>>, vector<16x256xf32>
    tpu.vector_store %arg8[%c48, %c0_26], %35 {strides = array<i32>} : memref<144x256xf32, #tpu.memory_space<vmem>>, vector<16x256xf32>,
    %c64 = arith.constant 64 : index
    %c0_27 = arith.constant 0 : index
    %37 = vector.load %arg8[%c64, %c0_27] : memref<144x256xf32, #tpu.memory_space<vmem>>, vector<16x256xf32>
    tpu.vector_store %arg8[%c64, %c0_27], %16 {strides = array<i32>} : memref<144x256xf32, #tpu.memory_space<vmem>>, vector<16x256xf32>,
    %c255_i32 = arith.constant 255 : i32
    %38 = tpu.dynamic_rotate %16 by %c255_i32 dim 1 : vector<16x256xf32>, i32 -> vector<16x256xf32>
    %c5 = arith.constant 5 : index
    %c0_28 = arith.constant 0 : index
    %39 = vector.load %arg3[%c5, %c0_28] : memref<9x256xf32, #tpu.memory_space<vmem>>, vector<1x256xf32>
    %40 = vector.broadcast %39 : vector<1x256xf32> to vector<16x256xf32>
    %41 = arith.mulf %38, %40 : vector<16x256xf32>
    %c80 = arith.constant 80 : index
    %c0_29 = arith.constant 0 : index
    %42 = vector.load %arg8[%c80, %c0_29] : memref<144x256xf32, #tpu.memory_space<vmem>>, vector<16x256xf32>
    tpu.vector_store %arg8[%c80, %c0_29], %41 {strides = array<i32>} : memref<144x256xf32, #tpu.memory_space<vmem>>, vector<16x256xf32>,
    %c241_i32 = arith.constant 241 : i32
    %43 = tpu.dynamic_rotate %16 by %c241_i32 dim 1 : vector<16x256xf32>, i32 -> vector<16x256xf32>
    %c6 = arith.constant 6 : index
    %c0_30 = arith.constant 0 : index
    %44 = vector.load %arg3[%c6, %c0_30] : memref<9x256xf32, #tpu.memory_space<vmem>>, vector<1x256xf32>
    %45 = vector.broadcast %44 : vector<1x256xf32> to vector<16x256xf32>
    %46 = arith.mulf %43, %45 : vector<16x256xf32>
    %c96 = arith.constant 96 : index
    %c0_31 = arith.constant 0 : index
    %47 = vector.load %arg8[%c96, %c0_31] : memref<144x256xf32, #tpu.memory_space<vmem>>, vector<16x256xf32>
    tpu.vector_store %arg8[%c96, %c0_31], %46 {strides = array<i32>} : memref<144x256xf32, #tpu.memory_space<vmem>>, vector<16x256xf32>,
    %c240_i32 = arith.constant 240 : i32
    %48 = tpu.dynamic_rotate %16 by %c240_i32 dim 1 : vector<16x256xf32>, i32 -> vector<16x256xf32>
    %c7 = arith.constant 7 : index
    %c0_32 = arith.constant 0 : index
    %49 = vector.load %arg3[%c7, %c0_32] : memref<9x256xf32, #tpu.memory_space<vmem>>, vector<1x256xf32>
    %50 = vector.broadcast %49 : vector<1x256xf32> to vector<16x256xf32>
    %51 = arith.mulf %48, %50 : vector<16x256xf32>
    %c112 = arith.constant 112 : index
    %c0_33 = arith.constant 0 : index
    %52 = vector.load %arg8[%c112, %c0_33] : memref<144x256xf32, #tpu.memory_space<vmem>>, vector<16x256xf32>
    tpu.vector_store %arg8[%c112, %c0_33], %51 {strides = array<i32>} : memref<144x256xf32, #tpu.memory_space<vmem>>, vector<16x256xf32>,
    %c239_i32 = arith.constant 239 : i32
    %53 = tpu.dynamic_rotate %16 by %c239_i32 dim 1 : vector<16x256xf32>, i32 -> vector<16x256xf32>
    %c8_34 = arith.constant 8 : index
    %c0_35 = arith.constant 0 : index
    %54 = vector.load %arg3[%c8_34, %c0_35] : memref<9x256xf32, #tpu.memory_space<vmem>>, vector<1x256xf32>
    %55 = vector.broadcast %54 : vector<1x256xf32> to vector<16x256xf32>
    %56 = arith.mulf %53, %55 : vector<16x256xf32>
    %c128 = arith.constant 128 : index
    %c0_36 = arith.constant 0 : index
    %57 = vector.load %arg8[%c128, %c0_36] : memref<144x256xf32, #tpu.memory_space<vmem>>, vector<16x256xf32>
    tpu.vector_store %arg8[%c128, %c0_36], %56 {strides = array<i32>} : memref<144x256xf32, #tpu.memory_space<vmem>>, vector<16x256xf32>,
    %c0_37 = arith.constant 0 : index
    %c0_38 = arith.constant 0 : index
    %58 = vector.load %arg4[%c0_37, %c0_38] : memref<8x144xf32, #tpu.memory_space<vmem>>, vector<8x144xf32>
    %c0_39 = arith.constant 0 : index
    %c0_40 = arith.constant 0 : index
    %59 = vector.load %arg8[%c0_39, %c0_40] : memref<144x256xf32, #tpu.memory_space<vmem>>, vector<144x256xf32>
    %cst_41 = arith.constant dense<0.000000e+00> : vector<8x256xf32>
    %60 = tpu.matmul %58, %59, %cst_41 {dimension_numbers = #tpu.dot_dimension_numbers<[1], [0], [0], [1], [0, 0, 1, 1], [], []>} : vector<8x144xf32>, vector<144x256xf32>, vector<8x256xf32> -> vector<8x256xf32>
    %c0_42 = arith.constant 0 : index
    %c2_43 = arith.constant 2 : index
    %61 = vector.load %arg5[%c0_42, %c2_43] : memref<16x8xf32, #tpu.memory_space<vmem>>, vector<8x1xf32>
    %62 = vector.broadcast %61 : vector<8x1xf32> to vector<8x256xf32>
    %63 = arith.addf %60, %62 : vector<8x256xf32>
    %cst_44 = arith.constant 0.000000e+00 : f32
    %64 = vector.broadcast %cst_44 : f32 to vector<8x256xf32>
    %65 = arith.maximumf %63, %64 : vector<8x256xf32>
    %c0_45 = arith.constant 0 : index
    %c3_46 = arith.constant 3 : index
    %66 = vector.load %arg5[%c0_45, %c3_46] : memref<16x8xf32, #tpu.memory_space<vmem>>, vector<8x1xf32>
    %67 = vector.broadcast %66 : vector<8x1xf32> to vector<8x256xf32>
    %68 = arith.mulf %65, %67 : vector<8x256xf32>
    %cst_47 = arith.constant dense<0.000000e+00> : vector<256xf32>
    %69 = vector.multi_reduction <add>, %68, %cst_47 [0] : vector<8x256xf32> to vector<256xf32>
    %70 = vector.shape_cast %69 : vector<256xf32> to vector<1x256xf32>
    %c0_48 = arith.constant 0 : index
    %c4 = arith.constant 4 : index
    %71 = vector.load %arg5[%c0_48, %c4] : memref<16x8xf32, #tpu.memory_space<vmem>>, vector<1x1xf32>
    %72 = vector.broadcast %71 : vector<1x1xf32> to vector<1x256xf32>
    %73 = arith.addf %70, %72 : vector<1x256xf32>
    %c0_49 = arith.constant 0 : index
    %c0_50 = arith.constant 0 : index
    %c0_51 = arith.constant 0 : index
    %74 = vector.load %arg2[%c0_49, %c0_50, %c0_51] : memref<1x6x256xf32, #tpu.memory_space<vmem>>, vector<1x6x256xf32>
    %75 = vector.shape_cast %74 : vector<1x6x256xf32> to vector<6x256xf32>
    %76 = vector.broadcast %73 : vector<1x256xf32> to vector<6x256xf32>
    %77 = arith.mulf %76, %75 : vector<6x256xf32>
    %c0_52 = arith.constant 0 : index
    %c0_53 = arith.constant 0 : index
    %c0_54 = arith.constant 0 : index
    %78 = vector.load %arg6[%c0_52, %c0_53, %c0_54] : memref<1x6x256xf32, #tpu.memory_space<vmem>>, vector<1x6x256xf32>
    %79 = vector.shape_cast %78 : vector<1x6x256xf32> to vector<6x256xf32>
    %80 = vector.shape_cast %77 : vector<6x256xf32> to vector<1x6x256xf32>
    tpu.vector_store %arg6[%c0_52, %c0_53, %c0_54], %80 {strides = array<i32>} : memref<1x6x256xf32, #tpu.memory_space<vmem>>, vector<1x6x256xf32>,
    return
  }
  func.func @transform_0(%arg0: i32) -> (i32, i32, i32) {
    %c0_i32 = arith.constant 0 : i32
    %c0_i32_0 = arith.constant 0 : i32
    %c0_i32_1 = arith.constant 0 : i32
    return %arg0, %c0_i32, %c0_i32_0 : i32, i32, i32
  }
  func.func @transform_1(%arg0: i32) -> (i32, i32, i32) {
    %c0_i32 = arith.constant 0 : i32
    %c0_i32_0 = arith.constant 0 : i32
    %c0_i32_1 = arith.constant 0 : i32
    return %arg0, %c0_i32, %c0_i32_0 : i32, i32, i32
  }
  func.func @transform_2(%arg0: i32) -> (i32, i32) {
    %c0_i32 = arith.constant 0 : i32
    %c0_i32_0 = arith.constant 0 : i32
    %c0_i32_1 = arith.constant 0 : i32
    return %c0_i32, %c0_i32_0 : i32, i32
  }
  func.func @transform_3(%arg0: i32) -> (i32, i32) {
    %c0_i32 = arith.constant 0 : i32
    %c0_i32_0 = arith.constant 0 : i32
    %c0_i32_1 = arith.constant 0 : i32
    return %c0_i32, %c0_i32_0 : i32, i32
  }
  func.func @transform_4(%arg0: i32) -> (i32, i32) {
    %c0_i32 = arith.constant 0 : i32
    %c0_i32_0 = arith.constant 0 : i32
    %c0_i32_1 = arith.constant 0 : i32
    return %c0_i32, %c0_i32_0 : i32, i32
  }
  func.func @transform_5(%arg0: i32) -> (i32, i32, i32) {
    %c0_i32 = arith.constant 0 : i32
    %c0_i32_0 = arith.constant 0 : i32
    %c0_i32_1 = arith.constant 0 : i32
    return %arg0, %c0_i32, %c0_i32_0 : i32, i32, i32
  }
}

</mosaic_0001>

<bundles_post_ra>
// kernel: tpu_custom_call.1
= control target key start
LH: loop header
LB: loop body
LE: loop exit
PB: predicated region body
PF: predicated region fallthrough
CT: control target
= control target key end

     0   :  { %10 = vsyncpa [#allocation5], 0  ;;  %s1012_s18 = smov 0   ;;  %s1206_s0 = inlined_call_operand.vmem [shape: f32[2,4,256], index: 0, kind: input, shape index: {}]   ;;  %s1207_s1 = inlined_call_operand.vmem [shape: f32[2,6,256], index: 1, kind: input, shape index: {}]   ;;  %s1208_s2 = inlined_call_operand.vmem [shape: f32[9,256], index: 2, kind: input, shape index: {}]   ;;  %s1209_s3 = inlined_call_operand.hbm [shape: f32[8,144], index: 3, kind: input, shape index: {}]   ;;  %s1210_s4 = inlined_call_operand.vmem [shape: f32[16,8], index: 4, kind: input, shape index: {}]   ;;  %s1211_s5 = inlined_call_operand.vmem [shape: f32[2,6,256], index: 5, kind: output, shape index: {}]  }
   0x1 LB: > { %s1018_s19 = sadd.s32 4294967295, %s965_s18   ;;  %p827_p0 = scmp.ge.s32.totalorder %s965_s18, 1  ;;  %s965_s18 = sphi %s1012_s18, %s16_s18  }
   0x2   : > { %p162_p1 = scmp.lt.s32.totalorder %s965_s18, 3  ;;  %p1212_p3 = scmp.eq.s32.totalorder %s1018_s19, 0 }
   0x3   : > { %s967_s21 = smov [#allocation4]   ;;  %s927_s26 = scalar_lea.hbm %s1209_s3, 256 }
   0x4   : > { %p1022_p2 = pnand %p827_p0, %p162_p1  ;;  %s178_s22 = sshll.u32 %s967_s21, 4  ;;  %s179_s22 = int_to_ptr.vmem [resolvable:$true] %s178_s22 }
   0x5   : > { %p928_p6 = scmp.ne.s32.totalorder %s1209_s3, %s927_s26  ;;  %p934_p10 = scmp.lt.u32.totalorder %s927_s26, %s1209_s3 }
   0x6   : > { %s1214_s20 = scalar_select %p1022_p2, 1, 0 }
   0x7   : > { %p891_p4 = pneg %p1022_p2 }
   0x9   : > { %p1031_p5 = pnand %p1212_p3, %p891_p4 }
   0xb   : > { %p929_p7 = pneg %p1031_p5 }
   0xd   : > { %p930_p8 = pnand %p929_p7, %p928_p6 }
   0xf   : > { %p931_p9 = pneg %p930_p8 }
  0x11   : > { %p936_p11 = pnand %p934_p10, %p931_p9 }
  0x13   : > { %939 = shalt.err (!%p936_p11)
}
  0x14   : > { %s940_s6 = scalar_lea.vmem %s179_s22, 256  ;;  %p948_p1 = scmp.lt.s32.totalorder %s179_s22, %s179_s22 }
  0x15   : > { %p941_p12 = scmp.ne.s32.totalorder %s179_s22, %s940_s6  ;;  %p949_p4 = scmp.lt.s32.totalorder %s940_s6, %s940_s6 }
  0x17   : > { %p943_p13 = pnand %p941_p12, %p929_p7  ;;  %p950_p3 = por %p949_p4, %p948_p1 }
  0x19   : > { %p944_p0 = pneg %p943_p13 }
  0x1b   : > { %p951_p2 = pnand %p950_p3, %p944_p0 }
  0x1d   : > { %954 = shalt.err (!%p951_p2)
}
  0x1e   : > { %894 = dma.hbm_to_vmem [thread:$0]  (!%p1031_p5), %s1209_s3, 256, %s179_s22, [#allocation5]  }
  0x1f   : > { %p1216_p6 = scmp.ne.s32.totalorder %s1214_s20, 0 }
  0x20   : > { %p1217_p8 = scmp.eq.s32.totalorder (!%p1216_p6), %s1018_s19, 0 }
  0x21   : > { %210 = sbr.rel (%p1216_p6) target bundleno = 603 (0x25b), region = 40 }
  0x28   : > { %960 = dma.done.wait (%p1217_p8), [#allocation5], 256   ;;  %p1218_p7 = pmov %p1217_p8 }
  0x29   : > { %p243_p9 = scmp.lt.s32.totalorder %s1018_s19, 1  ;;  %v968_v0 = vmov 1   ;;  %v969_v1 = vmov 0   ;;  %v970_v2 = vmov 0.0   ;;  %v1076_v3 = vld [vmem:[%s1210_s4] sm:$0xff]  ;;  %v273_v8 = vld [vmem:[%s1210_s4 + $0x8] sm:$0xff]  ;;  %v316_v36 = vlaneseq }
  0x2a   : > { %962 = vsyncadd (%p1218_p7), [#allocation5], 4294967040  ;;  %921 = vset.pattern.permute.xlu1 %v968_v0  ;;  %920 = vset.pattern.permute.xlu0 %v969_v1  ;;  %258 = vst [vmem:[#allocation2] sm:$0xff] %v970_v2  ;;  %s971_s23 = smov 17   ;;  %s972_s24 = smov 16   ;;  %v586_v31 = vld [vmem:[#allocation4 + $0x8] sm:$0xff] }
  0x2b   : > { %259 = vst [vmem:[#allocation2 + $0x8] sm:$0xff] %v970_v2  ;;  %260 = vst [vmem:[#allocation2 + $0x10] sm:$0xff] %v970_v2  ;;  %s1220_s19 = smov (!%p243_p9, %s1018_s19), 1  ;;  %293 = vperm.xlu1 %921, %v1076_v3   ;;  %280 = vperm.xlu0 %920, %v1076_v3   ;;  %s973_s25 = smov 15   ;;  %vm629_vm0 = vcmask 130048   ;;  %v979_v32 = vmov 2  }
  0x2c   : > { %261 = vst [vmem:[#allocation2 + $0x18] sm:$0xff] %v970_v2  ;;  %s848_s9 = sshll.u32 %s1220_s19, 3  ;;  %s849_s10 = sshll.u32 %s1220_s19, 4  ;;  %845 = vmatprep.mubr.msk.f32.mxu0 %vm629_vm0, %v586_v31  ;;  %v980_v33 = vmov 3   ;;  %v981_v34 = vmov 4   ;;  %v326_v37 = vshrl.u32 %v316_v36, 7 }
  0x2d   : > { %s247_s13 = scalar_lea.vmem %s1206_s0, %s848_s9  ;;  %s1071_s16 = scalar_lea.vmem %s1207_s1, %s849_s10  ;;  %v724_v35 = vld [vmem:[%s1210_s4] sm:$0x1]  ;;  %v1134_v39 = vand.u32 127, %v316_v36  ;;  %v838_v57 = vld [vmem:[%s1208_s2 + $0x1] ss:$8 sm:$0x3] }
  0x2e   : > { %v262_v4 = vld [vmem:[%s247_s13] sm:$0xff]  ;;  %v269_v7 = vld [vmem:[%s1071_s16 + $0x8] sm:$0x3f]  ;;  %s974_s26 = smov 1   ;;  %s975_s27 = smov 127   ;;  %v1136_v40 = vsub.s32 0, %v326_v37 }
  0x2f   : > { %v264_v5 = vcombine.high %v262_v4, %v262_v4  ;;  %266 = vst [vmem:[#allocation2] sm:$0xf] %v262_v4  ;;  %v268_v6 = vld [vmem:[%s1071_s16] sm:$0x3f]  ;;  %271 = vst [vmem:[#allocation2 + $0x18] sm:$0x3f] %v269_v7  ;;  %297 = vperm.xlu1 %921, %v273_v8   ;;  %285 = vperm.xlu0 %920, %v273_v8  }
  0x30   : > { %270 = vst [vmem:[#allocation2 + $0x10] sm:$0x3f] %v268_v6  ;;  %s976_s28 = smov 113   ;;  %s977_s29 = smov 112   ;;  %v1138_v41 = vsub.s32 1, %v326_v37  ;;  %vm318_vm1 = vcmp.lt.s32.totalorder %v1134_v39, 17  ;;  %v362_v62 = vrot.slane %v838_v57, %v1136_v40 }
  0x31   : > { %267 = vst [vmem:[#allocation2 + $0x8] sm:$0xf] %v264_v5  ;;  %s978_s30 = smov 111   ;;  %v323_v42 = vld [vmem:[%s1208_s2] ss:$8 sm:$0x3] }
  0x32   : > { %v328_v45 = vrot.slane %v323_v42, %v1136_v40  ;;  %v332_v46 = vrot.slane %v323_v42, %v1138_v41  ;;  %vm351_vm2 = vcmp.lt.s32.totalorder %v1134_v39, 16  ;;  %v366_v63 = vrot.slane %v838_v57, %v1138_v41 }
  0x33   : > { %922 = vset.pattern.permute.xlu0 %v979_v32  ;;  %923 = vset.pattern.permute.xlu1 %v980_v33  ;;  %vm385_vm3 = vcmp.lt.s32.totalorder %v1134_v39, 15  ;;  %v840_v33 = vld [vmem:[%s1208_s2 + $0x3] ss:$8 sm:$0x3]  ;;  %vm419_vm4 = vcmp.lt.s32.totalorder %v1134_v39, 1  ;;  %vm457_vm5 = vcmp.lt.s32.totalorder %v1134_v39, 127 }
  0x34   : > { %v434_v42 = vrot.slane %v840_v33, %v1138_v41  ;;  %vm491_vm6 = vcmp.lt.s32.totalorder %v1134_v39, 113  ;;  %vm525_vm7 = vcmp.lt.s32.totalorder %v1134_v39, 112  ;;  %vm559_vm8 = vcmp.lt.s32.totalorder %v1134_v39, 111 }
  0x36   : > { %v274_v9 = vld [vmem:[#allocation2] sm:$0xff]  ;;  %v277_v16 = vld [vmem:[#allocation2 + $0x18] sm:$0xff] }
  0x37   : > { %v276_v15 = vld [vmem:[#allocation2 + $0x10] sm:$0xff] }
  0x38   : > { %v275_v10 = vld [vmem:[#allocation2 + $0x8] sm:$0xff] }
  0xaa   : > { %v294_v11 = vpop.permute.xlu1 %293  ;;  %v281_v12 = vpop.permute.xlu0 %280 }
  0xab   : > { %v288_v13 = vmul.f32 %v281_v12, %v274_v9  ;;  %v289_v14 = vmul.f32 %v281_v12, %v275_v10  ;;  %v839_v10 = vld [vmem:[%s1208_s2 + $0x2] ss:$8 sm:$0x3] }
  0xad   : > { %v300_v17 = vadd.f32 %v294_v11, %v288_v13  ;;  %v301_v19 = vadd.f32 %v294_v11, %v289_v14 }
  0xae   : > { %v286_v18 = vpop.permute.xlu0 %285  ;;  %v298_v23 = vpop.permute.xlu1 %297 }
  0xaf   : > { %v1085_v20 = vmax.f32 %v300_v17, 0.0  ;;  %v290_v21 = vmul.f32 %v286_v18, %v276_v15  ;;  %v291_v22 = vmul.f32 %v286_v18, %v277_v16  ;;  %v1088_v26 = vmax.f32 %v301_v19, 0.0 }
  0xb0   : > { %v396_v15 = vrot.slane %v839_v10, %v1136_v40  ;;  %v400_v16 = vrot.slane %v839_v10, %v1138_v41 }
  0xb1   : > { %v302_v24 = vadd.f32 %v298_v23, %v290_v21  ;;  %v303_v25 = vadd.f32 %v298_v23, %v291_v22  ;;  %308 = vrot.lane.b32.xlu0 %v1085_v20, %s971_s23 }
  0xb3   : > { %v1090_v27 = vmax.f32 %v302_v24, 0.0  ;;  %v1092_v28 = vmax.f32 %v303_v25, 0.0 }
  0xb5   : > { %310 = vrot.lane.b32.xlu1 %v1090_v27, %s971_s23  ;;  %312 = vrot.lane.b32.xlu0 %v1088_v26, %s971_s23  ;;  %v867_v29 = vpack.c.bf16 %v1092_v28, %v1088_v26  ;;  %v869_v30 = vpack.c.bf16 %v1090_v27, %v1085_v20 }
  0xb9   : > { %314 = vrot.lane.b32.xlu1 %v1092_v28, %s971_s23  ;;  %343 = vrot.lane.b32.xlu0 %v1085_v20, %s972_s24 }
  0xbd   : > { %345 = vrot.lane.b32.xlu1 %v1090_v27, %s972_s24  ;;  %347 = vrot.lane.b32.xlu0 %v1088_v26, %s972_s24 }
  0xc1   : > { %349 = vrot.lane.b32.xlu1 %v1092_v28, %s972_s24  ;;  %377 = vrot.lane.b32.xlu0 %v1085_v20, %s973_s25 }
  0xc5   : > { %379 = vrot.lane.b32.xlu1 %v1090_v27, %s973_s25  ;;  %381 = vrot.lane.b32.xlu0 %v1088_v26, %s973_s25 }
  0xc9   : > { %383 = vrot.lane.b32.xlu1 %v1092_v28, %s973_s25  ;;  %411 = vrot.lane.b32.xlu0 %v1085_v20, %s974_s26 }
  0xcd   : > { %413 = vrot.lane.b32.xlu1 %v1090_v27, %s974_s26  ;;  %415 = vrot.lane.b32.xlu0 %v1088_v26, %s974_s26 }
  0xd1   : > { %417 = vrot.lane.b32.xlu1 %v1092_v28, %s974_s26  ;;  %449 = vrot.lane.b32.xlu0 %v1085_v20, %s975_s27 }
  0xd5   : > { %451 = vrot.lane.b32.xlu1 %v1090_v27, %s975_s27  ;;  %453 = vrot.lane.b32.xlu0 %v1088_v26, %s975_s27 }
  0xd9   : > { %455 = vrot.lane.b32.xlu1 %v1092_v28, %s975_s27  ;;  %483 = vrot.lane.b32.xlu0 %v1085_v20, %s976_s28 }
  0xdd   : > { %485 = vrot.lane.b32.xlu1 %v1090_v27, %s976_s28  ;;  %487 = vrot.lane.b32.xlu0 %v1088_v26, %s976_s28 }
  0xe1   : > { %489 = vrot.lane.b32.xlu1 %v1092_v28, %s976_s28  ;;  %517 = vrot.lane.b32.xlu0 %v1085_v20, %s977_s29 }
  0xe5   : > { %519 = vrot.lane.b32.xlu1 %v1090_v27, %s977_s29  ;;  %521 = vrot.lane.b32.xlu0 %v1088_v26, %s977_s29 }
  0xe9   : > { %523 = vrot.lane.b32.xlu1 %v1092_v28, %s977_s29  ;;  %551 = vrot.lane.b32.xlu0 %v1085_v20, %s978_s30 }
  0xed   : > { %553 = vrot.lane.b32.xlu1 %v1090_v27, %s978_s30  ;;  %555 = vrot.lane.b32.xlu0 %v1088_v26, %s978_s30 }
  0xf1   : > { %557 = vrot.lane.b32.xlu1 %v1092_v28, %s978_s30  ;;  %626 = vperm.xlu0 %922, %v1076_v3   ;;  %s257_s30 = scalar_lea.vmem %s1211_s5, %s849_s10 }
  0xf5   : > { %707 = vperm.xlu1 %923, %v1076_v3   ;;  %925 = vset.pattern.permute.xlu0 %v981_v34 }
  0xf9   : > { %924 = vset.pattern.permute.xlu1 %v981_v34 }
  0xfa   : > { %727 = vperm.xlu1 %924, %v724_v35  }
 0x123   : > { %v309_v38 = vpop.permute.xlu0 %308 }
 0x127   : > { %v311_v43 = vpop.permute.xlu1 %310  ;;  %v313_v44 = vpop.permute.xlu0 %312 }
 0x128   : > { %v319_v47 = vsel %vm318_vm1, %v309_v38, %v313_v44  ;;  %v321_v48 = vsel %vm318_vm1, %v313_v44, %v309_v38  ;;  %v430_v38 = vrot.slane %v840_v33, %v1136_v40 }
 0x129   : > { %v335_v53 = vmul.f32 %v328_v45, %v321_v48  ;;  %v336_v55 = vmul.f32 %v332_v46, %v319_v47 }
 0x12b   : > { %v315_v49 = vpop.permute.xlu1 %314  ;;  %v344_v50 = vpop.permute.xlu0 %343 }
 0x12c   : > { %v320_v51 = vsel %vm318_vm1, %v311_v43, %v315_v49  ;;  %v322_v52 = vsel %vm318_vm1, %v315_v49, %v311_v43 }
 0x12d   : > { %v337_v54 = vmul.f32 %v328_v45, %v322_v52  ;;  %v338_v56 = vmul.f32 %v332_v46, %v320_v51 }
 0x12f   : > { %v346_v58 = vpop.permute.xlu1 %345  ;;  %v348_v59 = vpop.permute.xlu0 %347  ;;  %v851_v60 = vpack.c.bf16 %v338_v56, %v336_v55  ;;  %v853_v61 = vpack.c.bf16 %v337_v54, %v335_v53  ;;  %v841_v53 = vld [vmem:[%s1208_s2 + $0x5] ss:$8 sm:$0x3] }
 0x130   : > { %v352_v0 = vsel %vm351_vm2, %v344_v50, %v348_v59  ;;  %v354_v1 = vsel %vm351_vm2, %v348_v59, %v344_v50  ;;  %v472_v59 = vrot.slane %v841_v53, %v1138_v41 }
 0x131   : > { %852 = vmatprep.subr.bf16.mxu0 %v851_v60  ;;  %v369_v6 = vmul.f32 %v362_v62, %v354_v1  ;;  %v370_v7 = vmul.f32 %v366_v63, %v352_v0 }
 0x132   : > { %854 = vmatpush1.bf16.msra.mxu0 %v853_v61 }
 0x133   : > { %v350_v2 = vpop.permute.xlu1 %349  ;;  %v378_v3 = vpop.permute.xlu0 %377 }
 0x134   : > { %v353_v4 = vsel %vm351_vm2, %v346_v58, %v350_v2  ;;  %v355_v5 = vsel %vm351_vm2, %v350_v2, %v346_v58  ;;  %v468_v58 = vrot.slane %v841_v53, %v1136_v40 }
 0x135   : > { %v371_v8 = vmul.f32 %v362_v62, %v355_v5  ;;  %v372_v9 = vmul.f32 %v366_v63, %v353_v4 }
 0x137   : > { %v380_v11 = vpop.permute.xlu1 %379  ;;  %v382_v12 = vpop.permute.xlu0 %381  ;;  %v855_v13 = vpack.c.bf16 %v372_v9, %v370_v7  ;;  %v857_v14 = vpack.c.bf16 %v371_v8, %v369_v6  ;;  %v842_v6 = vld [vmem:[%s1208_s2 + $0x6] ss:$8 sm:$0x3] }
 0x138   : > { %v386_v17 = vsel %vm385_vm3, %v378_v3, %v382_v12  ;;  %v388_v18 = vsel %vm385_vm3, %v382_v12, %v378_v3  ;;  %v502_v8 = vrot.slane %v842_v6, %v1136_v40  ;;  %v506_v9 = vrot.slane %v842_v6, %v1138_v41 }
 0x139   : > { %856 = vmatprep.subr.bf16.mxu0 %v855_v13  ;;  %v403_v24 = vmul.f32 %v396_v15, %v388_v18  ;;  %v404_v25 = vmul.f32 %v400_v16, %v386_v17  ;;  %v843_v17 = vld [vmem:[%s1208_s2 + $0x7] ss:$8 sm:$0x3] }
 0x13a   : > { %858 = vmatpush1.bf16.msra.mxu0 %v857_v14 }
 0x13b   : > { %v384_v19 = vpop.permute.xlu1 %383  ;;  %v412_v21 = vpop.permute.xlu0 %411 }
 0x13c   : > { %v387_v22 = vsel %vm385_vm3, %v380_v11, %v384_v19  ;;  %v389_v23 = vsel %vm385_vm3, %v384_v19, %v380_v11 }
 0x13d   : > { %v405_v31 = vmul.f32 %v396_v15, %v389_v23  ;;  %v406_v32 = vmul.f32 %v400_v16, %v387_v22  ;;  %v536_v23 = vrot.slane %v843_v17, %v1136_v40 }
 0x13f   : > { %v414_v34 = vpop.permute.xlu1 %413  ;;  %v416_v35 = vpop.permute.xlu0 %415  ;;  %v859_v36 = vpack.c.bf16 %v406_v32, %v404_v25  ;;  %v861_v37 = vpack.c.bf16 %v405_v31, %v403_v24  ;;  %v540_v24 = vrot.slane %v843_v17, %v1138_v41 }
 0x140   : > { %v420_v43 = vsel %vm419_vm4, %v412_v21, %v416_v35  ;;  %v422_v44 = vsel %vm419_vm4, %v416_v35, %v412_v21 }
 0x141   : > { %860 = vmatprep.subr.bf16.mxu0 %v859_v36  ;;  %v437_v49 = vmul.f32 %v430_v38, %v422_v44  ;;  %v438_v50 = vmul.f32 %v434_v42, %v420_v43  ;;  %v844_v43 = vld [vmem:[%s1208_s2 + $0x10] ss:$8 sm:$0x3] }
 0x142   : > { %862 = vmatpush1.bf16.msra.mxu0 %v861_v37 }
 0x143   : > { %v418_v45 = vpop.permute.xlu1 %417  ;;  %v450_v46 = vpop.permute.xlu0 %449 }
 0x144   : > { %v421_v47 = vsel %vm419_vm4, %v414_v34, %v418_v45  ;;  %v423_v48 = vsel %vm419_vm4, %v418_v45, %v414_v34 }
 0x145   : > { %v439_v51 = vmul.f32 %v430_v38, %v423_v48  ;;  %v440_v52 = vmul.f32 %v434_v42, %v421_v47  ;;  %v570_v48 = vrot.slane %v844_v43, %v1136_v40 }
 0x147   : > { %v452_v54 = vpop.permute.xlu1 %451  ;;  %v454_v55 = vpop.permute.xlu0 %453  ;;  %v863_v56 = vpack.c.bf16 %v440_v52, %v438_v50  ;;  %v865_v57 = vpack.c.bf16 %v439_v51, %v437_v49  ;;  %v574_v49 = vrot.slane %v844_v43, %v1138_v41 }
 0x148   : > { %v458_v60 = vsel %vm457_vm5, %v450_v46, %v454_v55  ;;  %v460_v61 = vsel %vm457_vm5, %v454_v55, %v450_v46 }
 0x149   : > { %864 = vmatprep.subr.bf16.mxu0 %v863_v56  ;;  %v475_v2 = vmul.f32 %v468_v58, %v458_v60  ;;  %v476_v3 = vmul.f32 %v472_v59, %v460_v61  ;;  %v585_v60 = vld [vmem:[#allocation4] sm:$0xff] }
 0x14a   : > { %866 = vmatpush1.bf16.msra.mxu0 %v865_v57 }
 0x14b   : > { %v456_v62 = vpop.permute.xlu1 %455  ;;  %868 = vmatprep.subr.bf16.mxu0 %v867_v29  ;;  %v484_v63 = vpop.permute.xlu0 %483 }
 0x14c   : > { %v459_v0 = vsel %vm457_vm5, %v452_v54, %v456_v62  ;;  %v461_v1 = vsel %vm457_vm5, %v456_v62, %v452_v54 }
 0x14d   : > { %v477_v4 = vmul.f32 %v468_v58, %v459_v0  ;;  %v478_v5 = vmul.f32 %v472_v59, %v461_v1 }
 0x14e   : > { %870 = vmatpush1.bf16.msra.mxu0 %v869_v30 }
 0x14f   : > { %v486_v7 = vpop.permute.xlu1 %485  ;;  %v488_v26 = vpop.permute.xlu0 %487  ;;  %v871_v28 = vpack.c.bf16 %v478_v5, %v476_v3  ;;  %v873_v29 = vpack.c.bf16 %v477_v4, %v475_v2 }
 0x150   : > { %v492_v10 = vsel %vm491_vm6, %v484_v63, %v488_v26  ;;  %v494_v11 = vsel %vm491_vm6, %v488_v26, %v484_v63 }
 0x151   : > { %872 = vmatprep.subr.bf16.mxu0 %v871_v28  ;;  %v509_v13 = vmul.f32 %v502_v8, %v492_v10  ;;  %v510_v14 = vmul.f32 %v506_v9, %v494_v11 }
 0x152   : > { %874 = vmatpush1.bf16.msra.mxu0 %v873_v29 }
 0x153   : > { %v490_v20 = vpop.permute.xlu1 %489  ;;  %v518_v27 = vpop.permute.xlu0 %517 }
 0x154   : > { %v493_v30 = vsel %vm491_vm6, %v486_v7, %v490_v20  ;;  %v495_v12 = vsel %vm491_vm6, %v490_v20, %v486_v7 }
 0x155   : > { %v511_v15 = vmul.f32 %v502_v8, %v493_v30  ;;  %v512_v16 = vmul.f32 %v506_v9, %v495_v12 }
 0x157   : > { %v520_v18 = vpop.permute.xlu1 %519  ;;  %v522_v19 = vpop.permute.xlu0 %521  ;;  %v875_v21 = vpack.c.bf16 %v512_v16, %v510_v14  ;;  %v877_v22 = vpack.c.bf16 %v511_v15, %v509_v13  ;;  %v732_v14 = vld [vmem:[%s1071_s16] sm:$0x3f]  ;;  %v733_v16 = vld [vmem:[%s1071_s16 + $0x8] sm:$0x3f] }
 0x158   : > { %v526_v25 = vsel %vm525_vm7, %v518_v27, %v522_v19  ;;  %v528_v31 = vsel %vm525_vm7, %v522_v19, %v518_v27 }
 0x159   : > { %876 = vmatprep.subr.bf16.mxu0 %v875_v21  ;;  %v543_v36 = vmul.f32 %v536_v23, %v526_v25  ;;  %v544_v37 = vmul.f32 %v540_v24, %v528_v31 }
 0x15a   : > { %878 = vmatpush1.bf16.msra.mxu0 %v877_v22 }
 0x15b   : > { %v524_v32 = vpop.permute.xlu1 %523  ;;  %v552_v33 = vpop.permute.xlu0 %551 }
 0x15c   : > { %v527_v34 = vsel %vm525_vm7, %v520_v18, %v524_v32  ;;  %v529_v35 = vsel %vm525_vm7, %v524_v32, %v520_v18 }
 0x15d   : > { %v545_v38 = vmul.f32 %v536_v23, %v527_v34  ;;  %v546_v42 = vmul.f32 %v540_v24, %v529_v35 }
 0x15f   : > { %v554_v44 = vpop.permute.xlu1 %553  ;;  %v556_v45 = vpop.permute.xlu0 %555  ;;  %v879_v46 = vpack.c.bf16 %v546_v42, %v544_v37  ;;  %v881_v47 = vpack.c.bf16 %v545_v38, %v543_v36 }
 0x160   : > { %v560_v50 = vsel %vm559_vm8, %v552_v33, %v556_v45  ;;  %v562_v51 = vsel %vm559_vm8, %v556_v45, %v552_v33 }
 0x161   : > { %880 = vmatprep.subr.bf16.mxu0 %v879_v46  ;;  %v577_v55 = vmul.f32 %v570_v48, %v560_v50  ;;  %v578_v56 = vmul.f32 %v574_v49, %v562_v51 }
 0x162   : > { %882 = vmatpush1.bf16.msra.mxu0 %v881_v47 }
 0x163   : > { %v558_v52 = vpop.permute.xlu1 %557 }
 0x164   : > { %v561_v53 = vsel %vm559_vm8, %v554_v44, %v558_v52  ;;  %v563_v54 = vsel %vm559_vm8, %v558_v52, %v554_v44 }
 0x165   : > { %v579_v57 = vmul.f32 %v570_v48, %v561_v53  ;;  %v580_v58 = vmul.f32 %v574_v49, %v563_v54 }
 0x167   : > { %v883_v59 = vpack.c.bf16 %v580_v58, %v578_v56  ;;  %v885_v39 = vpack.c.bf16 %v579_v57, %v577_v55 }
 0x169   : > { %884 = vmatprep.subr.bf16.mxu0 %v883_v59 }
 0x16a   : > { %886 = vmatpush1.bf16.msra.mxu0 %v885_v39 }
 0x16d   : > { %698 = vmatmul.mubr.f32.vlgmr.msra.gmra.mrb[0].mxu0 %v585_v60 }
 0x170   : > { %v627_v61 = vpop.permute.xlu0 %626 }
 0x174   : > { %v708_v1 = vpop.permute.xlu1 %707 }
 0x179   : > { %v728_v20 = vpop.permute.xlu1 %727 }
 0x240   : > { %v699_v62 = vpop.f32.mrb[0].mxu0 }
 0x241   : > { %v700_v41 = vadd.f32 %v699_v62, %v627_v61  ;;  %v701_v63 = vpop.f32.mrb[1].mxu0 }
 0x242   : > { %v702_v0 = vadd.f32 %v701_v63, %v627_v61 }
 0x243   : > { %v704_v2 = vmax.f32 %v700_v41, 0.0 }
 0x244   : > { %v705_v3 = vmax.f32 %v702_v0, 0.0 }
 0x245   : > { %v710_v4 = vmul.f32 %v708_v1, %v704_v2 }
 0x246   : > { %v711_v5 = vmul.f32 %v708_v1, %v705_v3 }
 0x247   : > { %v712_v6 = vrot.slane %v710_v4, 4 }
 0x248   : > { %v718_v7 = vrot.slane %v711_v5, 4 }
 0x249   : > { %v713_v26 = vadd.f32 %v712_v6, %v710_v4 }
 0x24a   : > { %v719_v28 = vadd.f32 %v718_v7, %v711_v5 }
 0x24b   : > { %v714_v29 = vrot.slane %v713_v26, 2 }
 0x24c   : > { %v720_v8 = vrot.slane %v719_v28, 2 }
 0x24d   : > { %v715_v9 = vadd.f32 %v714_v29, %v713_v26 }
 0x24e   : > { %v721_v10 = vadd.f32 %v720_v8, %v719_v28 }
 0x24f   : > { %v716_v11 = vrot.slane %v715_v9, 1 }
 0x250   : > { %v722_v27 = vrot.slane %v721_v10, 1 }
 0x251   : > { %v717_v30 = vadd.f32 %v716_v11, %v715_v9 }
 0x252   : > { %v723_v12 = vadd.f32 %v722_v27, %v721_v10 }
 0x253   : > { %v730_v13 = vadd.f32 %v728_v20, %v717_v30 }
 0x254   : > { %v731_v15 = vadd.f32 %v728_v20, %v723_v12 }
 0x255   : > { %v737_v17 = vrot.slane %v730_v13, %v1136_v40 }
 0x256   : > { %v741_v18 = vrot.slane %v731_v15, %v1136_v40 }
 0x257   : > { %v742_v19 = vmul.f32 %v737_v17, %v732_v14 }
 0x258   : > { %v743_v21 = vmul.f32 %v741_v18, %v733_v16 }
 0x259   : > { %744 = vst [vmem:[%s257_s30] sm:$0x3f] %v742_v19 }
 0x25a   : > { %745 = vst [vmem:[%s257_s30 + $0x8] sm:$0x3f] %v743_v21 }
 0x25b PF: > { %s16_s18 = sadd.s32 1, %s965_s18  }
 0x25c   : > { %p13_p2 = scmp.ge.s32.totalorder %s16_s18, 4  }
 0x25e   :  { %15 = sbr.rel (!%p13_p2) target bundleno = 1 (0x1), region = 85 }
 0x265   :  { %767 = vsyncpa [#allocation5], 1 }
 0x266   :  { %769 = vsyncpa [#allocation5 + $0x1], 1 }

</bundles_post_ra>
